<compile_context>
chip_gen: v7x
topology: tpu7x:2x2x1
jax: 0.10.0
libtpu: 0.0.40
codegen_flags: <defaults>
</compile_context>

<pallas_src>
import functools

import jax
import jax.numpy as jnp
from jax.experimental import pallas as pl
from jax.experimental.pallas import tpu as pltpu


def _cdiv(a, b):
    return -(-a // b)


def _round_up(x, m):
    return _cdiv(x, m) * m


def _pick_tile(dim, target, granule):
    """Tile size <= target, multiple of `granule`, minimizing padding of `dim`."""
    t0 = min(target, _round_up(dim, granule))
    n_tiles = _cdiv(dim, t0)
    tile = _round_up(_cdiv(dim, n_tiles), granule)
    return tile, n_tiles * tile  # (tile, padded_dim)


def _tied_linear_kernel_single(x_ref, w_ref, b_ref, o_ref, *, compute_dtype):
    """Fast path: grid = (M//tm, N//tn); whole K reduction in one MXU pass."""
    a = x_ref[...]
    w = w_ref[...]
    if compute_dtype is not None:
        a = a.astype(compute_dtype)
        w = w.astype(compute_dtype)
    acc = jnp.dot(a, w, preferred_element_type=jnp.float32)
    o_ref[...] = (acc + b_ref[...]).astype(o_ref.dtype)


def _tied_linear_kernel_reduce(x_ref, w_ref, b_ref, o_ref, acc_ref, *, compute_dtype):
    """Grid = (M//tm, N//tn, K//tk). K is the last ('arbitrary') reduction axis."""
    k = pl.program_id(2)
    a = x_ref[...]
    w = w_ref[...]
    if compute_dtype is not None:
        a = a.astype(compute_dtype)
        w = w.astype(compute_dtype)
    prod = jnp.dot(a, w, preferred_element_type=jnp.float32)

    @pl.when(k == 0)
    def _():
        acc_ref[...] = prod          # first step: store, skip the zero-init pass

    @pl.when(k != 0)
    def _():
        acc_ref[...] += prod

    @pl.when(k == pl.num_programs(2) - 1)
    def _():
        # bias tile is (1, tn); broadcasts over the tm rows of the output tile.
        o_ref[...] = (acc_ref[...] + b_ref[...]).astype(o_ref.dtype)


@functools.partial(
    jax.jit, static_argnames=("compute_dtype", "tm_max", "tn_max", "tk_max")
)
def tied_linear(x, weight, bias, *, compute_dtype=None,
                tm_max=256, tn_max=512, tk_max=512):
    """y = F.linear(x, weight.T, bias) == x @ weight + bias.

    x:      (..., K)   with K == weight.shape[0] (out_features of the tied Linear)
    weight: (K, N)     (PyTorch nn.Linear weight layout: (out_features, in_features))
    bias:   (K,)       (tied bias; requires K == N to broadcast, as in PyTorch)
    compute_dtype: optional MXU operand dtype (e.g. jnp.bfloat16); cast happens
                   inside the kernel, accumulation stays f32, output keeps x.dtype.
    """
    K, N = weight.shape
    assert x.shape[-1] == K, (x.shape, weight.shape)
    lead = x.shape[:-1]
    out_dtype = x.dtype

    x2d = x.reshape(-1, K)
    M = x2d.shape[0]

    # ---- tile selection (MXU-sized, comfortably inside scoped VMEM) ----
    tm, M_pad = _pick_tile(M, tm_max, 8)
    tn, N_pad = _pick_tile(N, tn_max, 128)
    tk, K_pad = _pick_tile(K, tk_max, 128)

    # ---- zero-pad to the tile grid only when needed (zeros don't affect the
    #      valid output slab) ----
    if (M_pad, K_pad) != (M, K):
        x2d = jnp.pad(x2d, ((0, M_pad - M), (0, K_pad - K)))
    if (K_pad, N_pad) != (K, N):
        weight = jnp.pad(weight, ((0, K_pad - K), (0, N_pad - N)))
    b2d = jnp.pad(bias.astype(jnp.float32), (0, N_pad - N)).reshape(1, N_pad)

    grid_m, grid_n, grid_k = M_pad // tm, N_pad // tn, K_pad // tk

    elt = 2 if compute_dtype == jnp.bfloat16 else 4
    cost = pl.CostEstimate(
        flops=2 * M_pad * N_pad * K_pad,
        transcendentals=0,
        bytes_accessed=(M_pad * K_pad + K_pad * N_pad) * 4
                       + M_pad * N_pad * jnp.dtype(out_dtype).itemsize
                       + N_pad * 4 + 0 * elt,
    )

    if grid_k == 1:
        # Small-K fast path: no reduction axis, no accumulator scratch.
        kern = functools.partial(_tied_linear_kernel_single,
                                 compute_dtype=compute_dtype)
        out = pl.pallas_call(
            kern,
            out_shape=jax.ShapeDtypeStruct((M_pad, N_pad), out_dtype),
            grid_spec=pltpu.PrefetchScalarGridSpec(
                num_scalar_prefetch=0,
                grid=(grid_m, grid_n),
                in_specs=[
                    pl.BlockSpec((tm, K_pad), lambda i, j: (i, 0)),   # x tile
                    pl.BlockSpec((K_pad, tn), lambda i, j: (0, j)),   # W tile
                    pl.BlockSpec((1, tn), lambda i, j: (0, j)),       # bias tile
                ],
                out_specs=pl.BlockSpec((tm, tn), lambda i, j: (i, j)),
            ),
            compiler_params=pltpu.CompilerParams(
                dimension_semantics=("parallel", "parallel")
            ),
            cost_estimate=cost,
        )(x2d, weight, b2d)
    else:
        kern = functools.partial(_tied_linear_kernel_reduce,
                                 compute_dtype=compute_dtype)
        out = pl.pallas_call(
            kern,
            out_shape=jax.ShapeDtypeStruct((M_pad, N_pad), out_dtype),
            grid_spec=pltpu.PrefetchScalarGridSpec(
                num_scalar_prefetch=0,
                grid=(grid_m, grid_n, grid_k),
                in_specs=[
                    pl.BlockSpec((tm, tk), lambda i, j, k: (i, k)),   # x tile
                    pl.BlockSpec((tk, tn), lambda i, j, k: (k, j)),   # W tile
                    pl.BlockSpec((1, tn), lambda i, j, k: (0, j)),    # bias tile
                ],
                out_specs=pl.BlockSpec((tm, tn), lambda i, j, k: (i, j)),
                scratch_shapes=[pltpu.VMEM((tm, tn), jnp.float32)],
            ),
            compiler_params=pltpu.CompilerParams(
                dimension_semantics=("parallel", "parallel", "arbitrary")
            ),
            cost_estimate=cost,
        )(x2d, weight, b2d)

    return out[:M, :N].reshape(*lead, N)


if __name__ == "__main__":
    key = jax.random.PRNGKey(0)

    # --- check 1: small tied-AE decoder, f32, exercises the single-shot fast path ---
    batch, seq, d = 2, 8, 256
    k1, k2, k3, key = jax.random.split(key, 4)
    x = jax.random.normal(k1, (batch, seq, d), dtype=jnp.float32)
    weight = jax.random.normal(k2, (d, d), dtype=jnp.float32) * 0.02  # nn.Linear(d, d).weight
    bias = jax.random.normal(k3, (d,), dtype=jnp.float32) * 0.01      # nn.Linear(d, d).bias
    y = jax.block_until_ready(tied_linear(x, weight, bias))
    y_ref = jnp.einsum("bsk,kn->bsn", x, weight) + bias               # F.linear(x, W.t(), b)
    assert y.shape == (batch, seq, d), y.shape
    assert jnp.allclose(y, y_ref, atol=1e-4, rtol=1e-4), "f32 fast-path mismatch"

    # --- check 2: K-reduction + padding path, bf16 MXU operands / f32 accumulation ---
    batch, seq, d = 2, 40, 768
    k1, k2, k3, key = jax.random.split(key, 4)
    x = jax.random.normal(k1, (batch, seq, d), dtype=jnp.float32)
    weight = jax.random.normal(k2, (d, d), dtype=jnp.float32) * 0.02
    bias = jax.random.normal(k3, (d,), dtype=jnp.float32) * 0.01
    y = jax.block_until_ready(
        tied_linear(x, weight, bias, compute_dtype=jnp.bfloat16)
    )
    y_ref = jnp.einsum("bsk,kn->bsn", x, weight) + bias
    assert y.shape == (batch, seq, d), y.shape
    assert jnp.allclose(y, y_ref, atol=3e-2, rtol=3e-2), "bf16 reduce-path mismatch"

    print("KERNEL_OK")
</pallas_src>

<mosaic_0001>
module attributes {stable_mosaic.version = 11 : i64} {
  func.func @_tied_linear_kernel_single(%arg0: i32, %arg1: i32, %arg2: memref<16x256xf32, #tpu.memory_space<vmem>>, %arg3: memref<256x256xf32, #tpu.memory_space<vmem>>, %arg4: memref<1x256xf32, #tpu.memory_space<vmem>>, %arg5: memref<16x256xf32, #tpu.memory_space<vmem>>) attributes {dimension_semantics = [#tpu.dimension_semantics<parallel>, #tpu.dimension_semantics<parallel>], iteration_bounds = array<i64: 1, 1>, scalar_prefetch = 0 : i64, scratch_operands = 0 : i64, tpu.core_type = #tpu.core_type<tc>, window_params = [{transform_indices = @transform_0, window_bounds = array<i64: 16, 256>}, {transform_indices = @transform_1, window_bounds = array<i64: 256, 256>}, {transform_indices = @transform_2, window_bounds = array<i64: 1, 256>}, {transform_indices = @transform_3, window_bounds = array<i64: 16, 256>}]} {
    %c0 = arith.constant 0 : index
    %c0_0 = arith.constant 0 : index
    %0 = vector.load %arg2[%c0, %c0_0] : memref<16x256xf32, #tpu.memory_space<vmem>>, vector<16x256xf32>
    %c0_1 = arith.constant 0 : index
    %c0_2 = arith.constant 0 : index
    %1 = vector.load %arg3[%c0_1, %c0_2] : memref<256x256xf32, #tpu.memory_space<vmem>>, vector<256x256xf32>
    %cst = arith.constant dense<0.000000e+00> : vector<16x256xf32>
    %2 = tpu.matmul %0, %1, %cst {dimension_numbers = #tpu.dot_dimension_numbers<[1], [0], [0], [1], [0, 0, 1, 1], [], []>} : vector<16x256xf32>, vector<256x256xf32>, vector<16x256xf32> -> vector<16x256xf32>
    %c0_3 = arith.constant 0 : index
    %c0_4 = arith.constant 0 : index
    %3 = vector.load %arg4[%c0_3, %c0_4] : memref<1x256xf32, #tpu.memory_space<vmem>>, vector<1x256xf32>
    %4 = vector.broadcast %3 : vector<1x256xf32> to vector<16x256xf32>
    %5 = arith.addf %2, %4 : vector<16x256xf32>
    %c0_5 = arith.constant 0 : index
    %c0_6 = arith.constant 0 : index
    %6 = vector.load %arg5[%c0_5, %c0_6] : memref<16x256xf32, #tpu.memory_space<vmem>>, vector<16x256xf32>
    tpu.vector_store %arg5[%c0_5, %c0_6], %5 {strides = array<i32>} : memref<16x256xf32, #tpu.memory_space<vmem>>, vector<16x256xf32>,
    return
  }
  func.func @transform_0(%arg0: i32, %arg1: i32) -> (i32, i32) {
    %c0_i32 = arith.constant 0 : i32
    %c0_i32_0 = arith.constant 0 : i32
    return %arg0, %c0_i32 : i32, i32
  }
  func.func @transform_1(%arg0: i32, %arg1: i32) -> (i32, i32) {
    %c0_i32 = arith.constant 0 : i32
    %c0_i32_0 = arith.constant 0 : i32
    return %c0_i32, %arg1 : i32, i32
  }
  func.func @transform_2(%arg0: i32, %arg1: i32) -> (i32, i32) {
    %c0_i32 = arith.constant 0 : i32
    %c0_i32_0 = arith.constant 0 : i32
    return %c0_i32, %arg1 : i32, i32
  }
  func.func @transform_3(%arg0: i32, %arg1: i32) -> (i32, i32) {
    %c0_i32 = arith.constant 0 : i32
    return %arg0, %arg1 : i32, i32
  }
}

</mosaic_0001>

<bundles_post_ra>
// kernel: tied_linear.1
= control target key start
LH: loop header
LB: loop body
LE: loop exit
PB: predicated region body
PF: predicated region fallthrough
CT: control target
= control target key end

     0   :  { %8 = vsyncpa [#allocation3], 0  ;;  %s468_s0 = inlined_call_operand.hbm [shape: f32[16,256], index: 0, kind: input, shape index: {}]   ;;  %s469_s1 = inlined_call_operand.hbm [shape: f32[256,256], index: 1, kind: input, shape index: {}]   ;;  %s470_s2 = inlined_call_operand.vmem [shape: f32[1,256], index: 2, kind: input, shape index: {}]   ;;  %s471_s3 = inlined_call_operand.hbm [shape: f32[16,256], index: 3, kind: output, shape index: {}]  }
   0x1   :  { %9 = vsyncpa [#allocation6], 0 }
   0x2   :  { %10 = vsyncpa [#allocation4], 0  ;;  %s395_s12 = smov [#allocation2]   ;;  %s323_s16 = scalar_lea.hbm %s468_s0, 512 }
   0x3   :  { %s16_s13 = sshll.u32 %s395_s12, 4  ;;  %p324_p0 = scmp.ne.s32.totalorder %s468_s0, %s323_s16  ;;  %s17_s13 = int_to_ptr.vmem [resolvable:$true] %s16_s13 }
   0x4   :  { %p327_p1 = scmp.lt.u32.totalorder %s323_s16, %s468_s0 }
   0x6   :  { %p329_p2 = pnand %p327_p1, %p324_p0 }
   0x8   :  { %332 = shalt.err (!%p329_p2)
}
   0x9   :  { %s333_s21 = scalar_lea.vmem %s17_s13, 512  ;;  %p338_p4 = scmp.lt.s32.totalorder %s17_s13, %s17_s13 }
   0xa   :  { %p334_p3 = scmp.ne.s32.totalorder %s17_s13, %s333_s21  ;;  %p339_p5 = scmp.lt.s32.totalorder %s333_s21, %s333_s21 }
   0xc   :  { %p340_p6 = por %p339_p5, %p338_p4 }
   0xe   :  { %p341_p7 = pnand %p340_p6, %p334_p3 }
  0x10   :  { %344 = shalt.err (!%p341_p7)
}
  0x11   :  { %s396_s22 = smov 256   ;;  %s397_s23 = smov 16  }
  0x12   :  { %22 = dma.hbm_to_vmem [thread:$0]  %s468_s0, 512, %s17_s13, [#allocation3], %s396_s22, %s396_s22, %s397_s23  }
  0x13   :  { %s398_s26 = smov [#allocation5]   ;;  %s345_s30 = scalar_lea.hbm %s469_s1, 8192 }
  0x14   :  { %s28_s27 = sshll.u32 %s398_s26, 4  ;;  %p346_p8 = scmp.ne.s32.totalorder %s469_s1, %s345_s30  ;;  %s29_s27 = int_to_ptr.vmem [resolvable:$true] %s28_s27 }
  0x15   :  { %p349_p9 = scmp.lt.u32.totalorder %s345_s30, %s469_s1 }
  0x17   :  { %p351_p10 = pnand %p349_p9, %p346_p8 }
  0x19   :  { %354 = shalt.err (!%p351_p10)
}
  0x1a   :  { %s355_s8 = scalar_lea.vmem %s29_s27, 8192  ;;  %p360_p12 = scmp.lt.s32.totalorder %s29_s27, %s29_s27 }
  0x1b   :  { %p356_p11 = scmp.ne.s32.totalorder %s29_s27, %s355_s8  ;;  %p361_p13 = scmp.lt.s32.totalorder %s355_s8, %s355_s8 }
  0x1d   :  { %p362_p0 = por %p361_p13, %p360_p12 }
  0x1f   :  { %p363_p1 = pnand %p362_p0, %p356_p11 }
  0x21   :  { %366 = shalt.err (!%p363_p1)
}
  0x22   :  { %34 = dma.hbm_to_vmem [thread:$0]  %s469_s1, 8192, %s29_s27, [#allocation6], %s396_s22, %s396_s22, %s397_s23  }
  0x23   :  { %389 = dma.done.wait [#allocation3], 512  }
  0x24   :  { %390 = vsyncadd [#allocation3], 4294966784 }
  0x25   :  { %391 = dma.done.wait [#allocation6], 8192  }
  0x26   :  { %392 = vsyncadd [#allocation6], 4294959104  ;;  %v48_v0 = vld [vmem:[#allocation5 + $0x8] sm:$0xff]  ;;  %v50_v1 = vld [vmem:[#allocation5 + $0x18] sm:$0xff]  ;;  %s399_s11 = smov [#allocation7]  }
  0x27   :  { %v47_v2 = vld [vmem:[#allocation5] sm:$0xff]  ;;  %v222_v3 = vpack.c.bf16 %v50_v1, %v48_v0  ;;  %v49_v4 = vld [vmem:[#allocation5 + $0x10] sm:$0xff]  ;;  %v52_v5 = vld [vmem:[#allocation5 + $0x28] sm:$0xff]  ;;  %s209_s12 = sshll.u32 %s399_s11, 4  ;;  %s210_s12 = int_to_ptr.vmem [resolvable:$true] %s209_s12 }
  0x28   :  { %v54_v6 = vld [vmem:[#allocation5 + $0x38] sm:$0xff]  ;;  %v224_v7 = vpack.c.bf16 %v49_v4, %v47_v2  ;;  %v51_v9 = vld [vmem:[#allocation5 + $0x20] sm:$0xff]  ;;  %v53_v10 = vld [vmem:[#allocation5 + $0x30] sm:$0xff]  ;;  %s367_s13 = scalar_lea.vmem %s210_s12, 512  ;;  %p372_p3 = scmp.lt.s32.totalorder %s210_s12, %s210_s12 }
  0x29   :  { %v226_v8 = vpack.c.bf16 %v54_v6, %v52_v5  ;;  %v56_v11 = vld [vmem:[#allocation5 + $0x48] sm:$0xff]  ;;  %223 = vmatprep.subr.bf16.mxu0 %v222_v3  ;;  %286 = vmatprep.subr.bf16.mxu1 %v222_v3  ;;  %v58_v12 = vld [vmem:[#allocation5 + $0x58] sm:$0xff]  ;;  %v228_v13 = vpack.c.bf16 %v53_v10, %v51_v9  ;;  %v55_v15 = vld [vmem:[#allocation5 + $0x40] sm:$0xff]  ;;  %p368_p2 = scmp.ne.s32.totalorder %s210_s12, %s367_s13  ;;  %p373_p4 = scmp.lt.s32.totalorder %s367_s13, %s367_s13 }
  0x2a   :  { %225 = vmatpush1.bf16.msra.mxu0 %v224_v7  ;;  %302 = vmatpush1.bf16.msra.mxu1 %v224_v7  ;;  %v230_v14 = vpack.c.bf16 %v58_v12, %v56_v11  ;;  %v57_v16 = vld [vmem:[#allocation5 + $0x50] sm:$0xff]  ;;  %v60_v17 = vld [vmem:[#allocation5 + $0x68] sm:$0xff]  ;;  %v62_v18 = vld [vmem:[#allocation5 + $0x78] sm:$0xff] }
  0x2b   :  { %227 = vmatprep.subr.bf16.mxu0 %v226_v8  ;;  %287 = vmatprep.subr.bf16.mxu1 %v226_v8  ;;  %v232_v19 = vpack.c.bf16 %v57_v16, %v55_v15  ;;  %v234_v20 = vpack.c.bf16 %v62_v18, %v60_v17  ;;  %v59_v21 = vld [vmem:[#allocation5 + $0x60] sm:$0xff]  ;;  %v61_v22 = vld [vmem:[#allocation5 + $0x70] sm:$0xff]  ;;  %v64_v23 = vld [vmem:[#allocation5 + $0x88] sm:$0xff]  ;;  %p374_p5 = por %p373_p4, %p372_p3 }
  0x2c   :  { %v66_v24 = vld [vmem:[#allocation5 + $0x98] sm:$0xff]  ;;  %v236_v25 = vpack.c.bf16 %v61_v22, %v59_v21  ;;  %v63_v27 = vld [vmem:[#allocation5 + $0x80] sm:$0xff]  ;;  %v65_v28 = vld [vmem:[#allocation5 + $0x90] sm:$0xff] }
  0x2d   :  { %v238_v26 = vpack.c.bf16 %v66_v24, %v64_v23  ;;  %v68_v29 = vld [vmem:[#allocation5 + $0xa8] sm:$0xff]  ;;  %v70_v30 = vld [vmem:[#allocation5 + $0xb8] sm:$0xff]  ;;  %v240_v31 = vpack.c.bf16 %v65_v28, %v63_v27  ;;  %v67_v33 = vld [vmem:[#allocation5 + $0xa0] sm:$0xff]  ;;  %p375_p6 = pnand %p374_p5, %p368_p2 }
  0x2e   :  { %229 = vmatpush1.bf16.msra.mxu0 %v228_v13  ;;  %303 = vmatpush1.bf16.msra.mxu1 %v228_v13  ;;  %v242_v32 = vpack.c.bf16 %v70_v30, %v68_v29  ;;  %v69_v34 = vld [vmem:[#allocation5 + $0xb0] sm:$0xff]  ;;  %v72_v35 = vld [vmem:[#allocation5 + $0xc8] sm:$0xff]  ;;  %v74_v36 = vld [vmem:[#allocation5 + $0xd8] sm:$0xff] }
  0x2f   :  { %231 = vmatprep.subr.bf16.mxu0 %v230_v14  ;;  %288 = vmatprep.subr.bf16.mxu1 %v230_v14  ;;  %v244_v37 = vpack.c.bf16 %v69_v34, %v67_v33  ;;  %v71_v38 = vld [vmem:[#allocation5 + $0xc0] sm:$0xff]  ;;  %v246_v39 = vpack.c.bf16 %v74_v36, %v72_v35  ;;  %v73_v40 = vld [vmem:[#allocation5 + $0xd0] sm:$0xff]  ;;  %v44_v41 = vld [vmem:[#allocation2 + $0x8] sm:$0xff]  ;;  %v113_v36 = vlaneseq }
  0x30   :  { %v46_v42 = vld [vmem:[#allocation2 + $0x18] sm:$0xff]  ;;  %v76_v43 = vld [vmem:[#allocation5 + $0xe8] sm:$0xff]  ;;  %187 = vmatprep.mubr.f32.mxu0 %v44_v41  ;;  %v248_v45 = vpack.c.bf16 %v73_v40, %v71_v38  ;;  %v75_v47 = vld [vmem:[#allocation5 + $0xe0] sm:$0xff] }
  0x31   :  { %v78_v44 = vld [vmem:[#allocation5 + $0xf8] sm:$0xff]  ;;  %193 = vmatprep.mubr.f32.mxu1 %v46_v42  ;;  %v77_v48 = vld [vmem:[#allocation5 + $0xf0] sm:$0xff]  ;;  %v80_v49 = vld [vmem:[#allocation5 + $0x108] sm:$0xff] }
  0x32   :  { %233 = vmatpush1.bf16.msra.mxu0 %v232_v19  ;;  %304 = vmatpush1.bf16.msra.mxu1 %v232_v19  ;;  %v250_v46 = vpack.c.bf16 %v78_v44, %v76_v43  ;;  %v82_v50 = vld [vmem:[#allocation5 + $0x118] sm:$0xff]  ;;  %v252_v51 = vpack.c.bf16 %v77_v48, %v75_v47  ;;  %v79_v53 = vld [vmem:[#allocation5 + $0x100] sm:$0xff]  ;;  %v81_v54 = vld [vmem:[#allocation5 + $0x110] sm:$0xff] }
  0x33   :  { %235 = vmatprep.subr.bf16.mxu0 %v234_v20  ;;  %289 = vmatprep.subr.bf16.mxu1 %v234_v20  ;;  %v254_v52 = vpack.c.bf16 %v82_v50, %v80_v49  ;;  %v84_v55 = vld [vmem:[#allocation5 + $0x128] sm:$0xff]  ;;  %v86_v56 = vld [vmem:[#allocation5 + $0x138] sm:$0xff]  ;;  %v256_v57 = vpack.c.bf16 %v81_v54, %v79_v53  ;;  %v83_v59 = vld [vmem:[#allocation5 + $0x120] sm:$0xff] }
  0x34   :  { %v258_v58 = vpack.c.bf16 %v86_v56, %v84_v55  ;;  %v85_v60 = vld [vmem:[#allocation5 + $0x130] sm:$0xff]  ;;  %v88_v61 = vld [vmem:[#allocation5 + $0x148] sm:$0xff]  ;;  %v90_v62 = vld [vmem:[#allocation5 + $0x158] sm:$0xff] }
  0x35   :  { %v260_v63 = vpack.c.bf16 %v85_v60, %v83_v59  ;;  %v262_v0 = vpack.c.bf16 %v90_v62, %v88_v61  ;;  %v87_v1 = vld [vmem:[#allocation5 + $0x140] sm:$0xff]  ;;  %v89_v2 = vld [vmem:[#allocation5 + $0x150] sm:$0xff]  ;;  %v92_v3 = vld [vmem:[#allocation5 + $0x168] sm:$0xff] }
  0x36   :  { %237 = vmatpush1.bf16.msra.mxu0 %v236_v25  ;;  %305 = vmatpush1.bf16.msra.mxu1 %v236_v25  ;;  %v94_v4 = vld [vmem:[#allocation5 + $0x178] sm:$0xff]  ;;  %v264_v5 = vpack.c.bf16 %v89_v2, %v87_v1  ;;  %v91_v7 = vld [vmem:[#allocation5 + $0x160] sm:$0xff]  ;;  %v93_v8 = vld [vmem:[#allocation5 + $0x170] sm:$0xff] }
  0x37   :  { %239 = vmatprep.subr.bf16.mxu0 %v238_v26  ;;  %290 = vmatprep.subr.bf16.mxu1 %v238_v26  ;;  %v266_v6 = vpack.c.bf16 %v94_v4, %v92_v3  ;;  %v96_v9 = vld [vmem:[#allocation5 + $0x188] sm:$0xff]  ;;  %v98_v10 = vld [vmem:[#allocation5 + $0x198] sm:$0xff]  ;;  %v268_v11 = vpack.c.bf16 %v93_v8, %v91_v7  ;;  %v95_v13 = vld [vmem:[#allocation5 + $0x180] sm:$0xff] }
  0x38   :  { %v270_v12 = vpack.c.bf16 %v98_v10, %v96_v9  ;;  %v97_v14 = vld [vmem:[#allocation5 + $0x190] sm:$0xff]  ;;  %v100_v15 = vld [vmem:[#allocation5 + $0x1a8] sm:$0xff]  ;;  %v102_v16 = vld [vmem:[#allocation5 + $0x1b8] sm:$0xff] }
  0x39   :  { %v272_v17 = vpack.c.bf16 %v97_v14, %v95_v13  ;;  %v274_v18 = vpack.c.bf16 %v102_v16, %v100_v15  ;;  %v99_v19 = vld [vmem:[#allocation5 + $0x1a0] sm:$0xff]  ;;  %v101_v20 = vld [vmem:[#allocation5 + $0x1b0] sm:$0xff]  ;;  %v104_v21 = vld [vmem:[#allocation5 + $0x1c8] sm:$0xff] }
  0x3a   :  { %241 = vmatpush1.bf16.msra.mxu0 %v240_v31  ;;  %306 = vmatpush1.bf16.msra.mxu1 %v240_v31  ;;  %v106_v22 = vld [vmem:[#allocation5 + $0x1d8] sm:$0xff]  ;;  %v276_v23 = vpack.c.bf16 %v101_v20, %v99_v19  ;;  %v103_v25 = vld [vmem:[#allocation5 + $0x1c0] sm:$0xff]  ;;  %v105_v26 = vld [vmem:[#allocation5 + $0x1d0] sm:$0xff] }
  0x3b   :  { %243 = vmatprep.subr.bf16.mxu0 %v242_v32  ;;  %291 = vmatprep.subr.bf16.mxu1 %v242_v32  ;;  %v278_v24 = vpack.c.bf16 %v106_v22, %v104_v21  ;;  %v108_v27 = vld [vmem:[#allocation5 + $0x1e8] sm:$0xff]  ;;  %v110_v28 = vld [vmem:[#allocation5 + $0x1f8] sm:$0xff]  ;;  %v280_v29 = vpack.c.bf16 %v105_v26, %v103_v25  ;;  %v107_v31 = vld [vmem:[#allocation5 + $0x1e0] sm:$0xff] }
  0x3c   :  { %v282_v30 = vpack.c.bf16 %v110_v28, %v108_v27  ;;  %v109_v32 = vld [vmem:[#allocation5 + $0x1f0] sm:$0xff]  ;;  %v43_v34 = vld [vmem:[#allocation2] sm:$0xff] }
  0x3d   :  { %v284_v33 = vpack.c.bf16 %v109_v32, %v107_v31  ;;  %v45_v35 = vld [vmem:[#allocation2 + $0x10] sm:$0xff] }
  0x3e   :  { %245 = vmatpush1.bf16.msra.mxu0 %v244_v37  ;;  %307 = vmatpush1.bf16.msra.mxu1 %v244_v37  ;;  %v114_v37 = vshrl.u32 %v113_v36, 7 }
  0x3f   :  { %247 = vmatprep.subr.bf16.mxu0 %v246_v39  ;;  %292 = vmatprep.subr.bf16.mxu1 %v246_v39  ;;  %v111_v39 = vld [vmem:[%s470_s2] sm:$0x3] }
  0x40   :  { %v115_v38 = vsub.s32 0, %v114_v37  ;;  %v119_v40 = vsub.s32 1, %v114_v37 }
  0x42   :  { %249 = vmatpush1.bf16.msra.mxu0 %v248_v45  ;;  %308 = vmatpush1.bf16.msra.mxu1 %v248_v45  ;;  %v116_v41 = vrot.slane %v111_v39, %v115_v38  ;;  %v120_v42 = vrot.slane %v111_v39, %v119_v40 }
  0x43   :  { %251 = vmatprep.subr.bf16.mxu0 %v250_v46  ;;  %293 = vmatprep.subr.bf16.mxu1 %v250_v46 }
  0x46   :  { %253 = vmatpush1.bf16.msra.mxu0 %v252_v51  ;;  %309 = vmatpush1.bf16.msra.mxu1 %v252_v51 }
  0x47   :  { %255 = vmatprep.subr.bf16.mxu0 %v254_v52  ;;  %294 = vmatprep.subr.bf16.mxu1 %v254_v52 }
  0x4a   :  { %257 = vmatpush1.bf16.msra.mxu0 %v256_v57  ;;  %310 = vmatpush1.bf16.msra.mxu1 %v256_v57 }
  0x4b   :  { %259 = vmatprep.subr.bf16.mxu0 %v258_v58  ;;  %295 = vmatprep.subr.bf16.mxu1 %v258_v58 }
  0x4e   :  { %261 = vmatpush1.bf16.msra.mxu0 %v260_v63  ;;  %311 = vmatpush1.bf16.msra.mxu1 %v260_v63 }
  0x4f   :  { %263 = vmatprep.subr.bf16.mxu0 %v262_v0  ;;  %296 = vmatprep.subr.bf16.mxu1 %v262_v0 }
  0x52   :  { %265 = vmatpush1.bf16.msra.mxu0 %v264_v5  ;;  %312 = vmatpush1.bf16.msra.mxu1 %v264_v5 }
  0x53   :  { %267 = vmatprep.subr.bf16.mxu0 %v266_v6  ;;  %297 = vmatprep.subr.bf16.mxu1 %v266_v6 }
  0x56   :  { %269 = vmatpush1.bf16.msra.mxu0 %v268_v11  ;;  %313 = vmatpush1.bf16.msra.mxu1 %v268_v11 }
  0x57   :  { %271 = vmatprep.subr.bf16.mxu0 %v270_v12  ;;  %298 = vmatprep.subr.bf16.mxu1 %v270_v12 }
  0x5a   :  { %273 = vmatpush1.bf16.msra.mxu0 %v272_v17  ;;  %314 = vmatpush1.bf16.msra.mxu1 %v272_v17 }
  0x5b   :  { %275 = vmatprep.subr.bf16.mxu0 %v274_v18  ;;  %299 = vmatprep.subr.bf16.mxu1 %v274_v18 }
  0x5e   :  { %277 = vmatpush1.bf16.msra.mxu0 %v276_v23  ;;  %315 = vmatpush1.bf16.msra.mxu1 %v276_v23 }
  0x5f   :  { %279 = vmatprep.subr.bf16.mxu0 %v278_v24  ;;  %300 = vmatprep.subr.bf16.mxu1 %v278_v24 }
  0x62   :  { %281 = vmatpush1.bf16.msra.mxu0 %v280_v29  ;;  %316 = vmatpush1.bf16.msra.mxu1 %v280_v29 }
  0x63   :  { %283 = vmatprep.subr.bf16.mxu0 %v282_v30  ;;  %301 = vmatprep.subr.bf16.mxu1 %v282_v30 }
  0x66   :  { %285 = vmatpush1.bf16.msra.mxu0 %v284_v33  ;;  %317 = vmatpush1.bf16.msra.mxu1 %v284_v33 }
  0x69   :  { %188 = vmatmul.mubr.f32.vlgmr.msra.gmra.mrb[0].mxu0 %v43_v34  ;;  %194 = vmatmul.mubr.f32.vlgmr.msra.gmra.mrb[0].mxu1 %v45_v35 }
 0x13c   :  { %v189_v43 = vpop.f32.mrb[0].mxu0  ;;  %v195_v44 = vpop.f32.mrb[0].mxu1 }
 0x13d   :  { %v190_v45 = vadd.f32 %v189_v43, %v116_v41  ;;  %v196_v46 = vadd.f32 %v195_v44, %v116_v41  ;;  %v191_v47 = vpop.f32.mrb[1].mxu0  ;;  %v197_v48 = vpop.f32.mrb[1].mxu1 }
 0x13e   :  { %v192_v49 = vadd.f32 %v191_v47, %v120_v42  ;;  %v198_v50 = vadd.f32 %v197_v48, %v120_v42 }
 0x13f   :  { %200 = vst [vmem:[#allocation7] sm:$0xff] %v190_v45  ;;  %202 = vst [vmem:[#allocation7 + $0x10] sm:$0xff] %v196_v46 }
 0x140   :  { %201 = vst [vmem:[#allocation7 + $0x8] sm:$0xff] %v192_v49  ;;  %203 = vst [vmem:[#allocation7 + $0x18] sm:$0xff] %v198_v50 }
 0x141   :  { %378 = shalt.err (!%p375_p6)
}
 0x142   :  { %s379_s15 = scalar_lea.hbm %s471_s3, 512 }
 0x143   :  { %p380_p7 = scmp.ne.s32.totalorder %s471_s3, %s379_s15  ;;  %p383_p8 = scmp.lt.u32.totalorder %s379_s15, %s471_s3 }
 0x145   :  { %p385_p9 = pnand %p383_p8, %p380_p7 }
 0x147   :  { %388 = shalt.err (!%p385_p9)
}
 0x148   :  { %215 = dma.vmem_to_hbm [thread:$0]  %s210_s12, 512, %s471_s3, [#allocation4], %s396_s22, %s396_s22, %s397_s23  }
 0x149   :  { %393 = dma.done.wait [#allocation4], 512  }
 0x14a   :  { %394 = vsyncadd [#allocation4], 4294966784 }
 0x14b   :  { %219 = vsyncpa [#allocation3], 1 }
 0x14c   :  { %220 = vsyncpa [#allocation6], 1 }
 0x14d   :  { %221 = vsyncpa [#allocation4], 1 }

</bundles_post_ra>
